<compile_context>
chip_gen: v5e
topology: v5e:2x2
jax: 0.10.0
libtpu: 0.0.40
codegen_flags: <defaults>
</compile_context>

<pallas_src>
import jax
import jax.numpy as jnp
from jax.experimental import pallas as pl
from jax.experimental.pallas import tpu as pltpu


def _round_up(v, m):
    return ((v + m - 1) // m) * m


def _vmem_budget_bytes():
    """Per-chip VMEM capacity minus ~10% headroom for internal scratch."""
    try:
        cap = int(pltpu.get_tpu_info().vmem_capacity_bytes)
    except Exception:                      # defensive: fall back to v7x figure
        cap = 64 * 1024 * 1024
    return int(cap * 0.9)


# ----------------------------------------------------------------------------
# Kernels
# ----------------------------------------------------------------------------

def _resident_kernel(x_ref, w_ref, b_ref, o_ref):
    # out = fn(X) + X with fn(X) = X @ W + b.  W fully resident in VMEM.
    x = x_ref[...]                                         # (tm, H) f32
    y = jnp.dot(x.astype(jnp.bfloat16), w_ref[...],        # bf16 x bf16 -> f32
                preferred_element_type=jnp.float32)
    o_ref[...] = (y + b_ref[...] + x).astype(o_ref.dtype)  # fused f32 epilogue


def _ntiled_kernel(xk_ref, xr_ref, w_ref, b_ref, o_ref):
    # Same math with W streamed over output-column tiles.  xk is the full-K
    # row tile (stays resident across the N axis); xr is the matching
    # residual column tile.
    y = jnp.dot(xk_ref[...].astype(jnp.bfloat16), w_ref[...],
                preferred_element_type=jnp.float32)
    o_ref[...] = (y + b_ref[...] + xr_ref[...]).astype(o_ref.dtype)


# ----------------------------------------------------------------------------
# Wrapper paths
# ----------------------------------------------------------------------------

def _resident_path(x, w, b, T, H, tm, budget, out_itemsize):
    w_bytes = H * H * 2                    # bf16, single-buffered
    b_bytes = H * 4

    # Row tile: as large as the remaining VMEM allows (X/out double-buffered),
    # but guarantee grid_t >= 2 so the "parallel" axis feeds both TensorCores
    # on megacore parts (v7x).
    per_row = 2 * H * 4 + 2 * H * out_itemsize
    max_tm = max(8, ((budget - w_bytes - 2 * b_bytes) // per_row) // 8 * 8)
    tm = max(8, min(_round_up(tm, 8), max_tm, _round_up(T, 8)))
    if _round_up(T, tm) // tm < 2 and tm > 8:
        tm = max(8, _round_up(tm // 2, 8))
    Tp = _round_up(T, tm)
    grid_t = Tp // tm

    padded = Tp != T
    x_p = x if not padded else jnp.pad(x, ((0, Tp - T), (0, 0)))

    cost = pl.CostEstimate(
        flops=2 * Tp * H * H,
        transcendentals=0,
        bytes_accessed=Tp * H * 4 + H * H * 2 + H * 4 + Tp * H * out_itemsize,
    )

    def _run(single_buffer_pinned):
        pinned_kw = (dict(pipeline_mode=pl.Buffered(1))
                     if single_buffer_pinned else {})
        return pl.pallas_call(
            _resident_kernel,
            out_shape=jax.ShapeDtypeStruct((Tp, H), x.dtype),
            grid_spec=pltpu.PrefetchScalarGridSpec(
                num_scalar_prefetch=0,
                grid=(grid_t,),
                in_specs=[
                    pl.BlockSpec((tm, H), lambda i: (i, 0)),        # X streamed
                    pl.BlockSpec((H, H), lambda i: (0, 0), **pinned_kw),  # W
                    pl.BlockSpec((1, H), lambda i: (0, 0), **pinned_kw),  # bias
                ],
                out_specs=pl.BlockSpec((tm, H), lambda i: (i, 0)),
            ),
            compiler_params=pltpu.CompilerParams(
                dimension_semantics=("parallel",),
                vmem_limit_bytes=budget,
            ),
            cost_estimate=cost,
            # Donate X only when the wrapper created a fresh padded buffer.
            input_output_aliases=({0: 0} if padded else {}),
        )(x_p, w, b)

    try:
        out = _run(True)          # single-buffered pinned W / bias
    except Exception:             # pipeline_mode unsupported -> default 2-buf
        out = _run(False)

    return out if not padded else out[:T]


def _ntiled_path(x, w, b, T, H, tm, tn, budget, out_itemsize):
    # Large hidden: bf16 W does not fit resident; stream W over output-column
    # tiles while a large full-K row tile of X stays resident across N.
    tn = min(tn, _round_up(H, 128))
    Hp = _round_up(H, tn)

    w_tile_bytes = 2 * Hp * tn * 2                     # streamed W, 2-buffered
    per_row = 2 * Hp * 4 + 2 * tn * 4 + 2 * tn * out_itemsize
    max_tm = max(8, ((budget - w_tile_bytes - 2 * tn * 4) // per_row) // 8 * 8)
    tm = max(8, min(_round_up(tm, 8), max_tm, _round_up(T, 8)))
    Tp = _round_up(T, tm)
    grid = (Tp // tm, Hp // tn)

    x_p = x if (Tp == T and Hp == H) else jnp.pad(x, ((0, Tp - T), (0, Hp - H)))
    w_p = w if Hp == H else jnp.pad(w, ((0, Hp - H), (0, Hp - H)))
    b_p = b if Hp == H else jnp.pad(b, ((0, 0), (0, Hp - H)))

    cost = pl.CostEstimate(
        flops=2 * Tp * Hp * Hp,
        transcendentals=0,
        bytes_accessed=(Tp * Hp * 4 + grid[0] * Hp * Hp * 2 + Hp * 4
                        + Tp * Hp * (4 + out_itemsize)),
    )

    out = pl.pallas_call(
        _ntiled_kernel,
        out_shape=jax.ShapeDtypeStruct((Tp, Hp), x.dtype),
        grid_spec=pltpu.PrefetchScalarGridSpec(
            num_scalar_prefetch=0,
            grid=grid,
            in_specs=[
                pl.BlockSpec((tm, Hp), lambda i, j: (i, 0)),   # X rows (full K)
                pl.BlockSpec((tm, tn), lambda i, j: (i, j)),   # residual cols
                pl.BlockSpec((Hp, tn), lambda i, j: (0, j)),   # W column block
                pl.BlockSpec((1, tn), lambda i, j: (0, j)),    # bias block
            ],
            out_specs=pl.BlockSpec((tm, tn), lambda i, j: (i, j)),
        ),
        compiler_params=pltpu.CompilerParams(
            dimension_semantics=("parallel", "parallel"),
            vmem_limit_bytes=budget,
        ),
        cost_estimate=cost,
    )(x_p, x_p, w_p, b_p)

    return out[:T, :H]


def residual_add_dec(x, w, b, *, tm=512, tn=512):
    """out = x @ w + b + x  (ResidualAdd_Dec with fn = Linear(H, H)).

    x: (T, H) f32.  w: (H, H) (ideally pre-cast bf16).  b: (1, H) f32.
    """
    T, H = x.shape
    assert w.shape == (H, H) and b.shape == (1, H)

    # Hoistable cast: no-op when the caller keeps bf16 weights (recommended;
    # avoids an H^2 f32->bf16 HBM pass per forward call).
    w = w if w.dtype == jnp.bfloat16 else w.astype(jnp.bfloat16)
    b = b.astype(jnp.float32)

    out_itemsize = jnp.dtype(x.dtype).itemsize
    budget = _vmem_budget_bytes()

    # Resident-W path while the single-buffered bf16 W slab leaves ample VMEM
    # for the streamed X/out tiles; otherwise stream W column blocks.
    if H * H * 2 + H * 4 <= int(budget * 0.6):
        return _resident_path(x, w, b, T, H, tm, budget, out_itemsize)
    return _ntiled_path(x, w, b, T, H, tm, tn, budget, out_itemsize)


if __name__ == "__main__":
    key = jax.random.PRNGKey(0)
    k_x, k_w, k_b = jax.random.split(key, 3)

    batch, seq, hidden = 2, 8, 32
    x = jax.random.normal(k_x, (batch, seq, hidden), dtype=jnp.float32)

    # Deterministic "Linear(hidden, hidden)" parameters for fn (synthetic).
    w = jax.random.normal(k_w, (hidden, hidden), dtype=jnp.float32) * 0.05
    b = jax.random.normal(k_b, (1, hidden), dtype=jnp.float32) * 0.05

    # Parameter setup done once (hoisted out of the per-call wrapper).
    w_bf16 = w.astype(jnp.bfloat16)

    x2d = x.reshape(batch * seq, hidden)
    out = residual_add_dec(x2d, w_bf16, b)
    out = jax.block_until_ready(out)

    # Reference 1: bf16-matmul-consistent reference (matches kernel math).
    ref_bf16 = (
        jnp.dot(x2d.astype(jnp.bfloat16), w_bf16,
                preferred_element_type=jnp.float32)
        + b + x2d
    )
    assert jnp.allclose(out, ref_bf16, atol=1e-3, rtol=1e-3), \
        "mismatch vs bf16-consistent reference"

    # Reference 2: plain f32 fn(X) + X (module semantics).  Loose tolerance
    # for the documented bf16-matmul precision contract (~sqrt(H) * 2^-8).
    ref_f32 = x2d @ w + b + x2d
    assert jnp.allclose(out, ref_f32, atol=2e-2, rtol=2e-2), \
        "mismatch vs f32 reference"

    out = out.reshape(batch, seq, hidden)
    print("KERNEL_OK")
</pallas_src>

<mosaic_0001>
module attributes {stable_mosaic.version = 11 : i64} {
  func.func @_resident_kernel(%arg0: i32, %arg1: memref<8x32xf32, #tpu.memory_space<vmem>>, %arg2: memref<32x32xbf16, #tpu.memory_space<vmem>>, %arg3: memref<1x32xf32, #tpu.memory_space<vmem>>, %arg4: memref<8x32xf32, #tpu.memory_space<vmem>>) attributes {dimension_semantics = [#tpu.dimension_semantics<parallel>], iteration_bounds = array<i64: 2>, scalar_prefetch = 0 : i64, scratch_operands = 0 : i64, tpu.core_type = #tpu.core_type<tc>, window_params = [{transform_indices = @transform_0, window_bounds = array<i64: 8, 32>}, {pipeline_mode = #tpu.pipeline_mode<synchronous>, transform_indices = @transform_1, window_bounds = array<i64: 32, 32>}, {pipeline_mode = #tpu.pipeline_mode<synchronous>, transform_indices = @transform_2, window_bounds = array<i64: 1, 32>}, {transform_indices = @transform_3, window_bounds = array<i64: 8, 32>}]} {
    %c0 = arith.constant 0 : index
    %c0_0 = arith.constant 0 : index
    %0 = vector.load %arg1[%c0, %c0_0] : memref<8x32xf32, #tpu.memory_space<vmem>>, vector<8x32xf32>
    %1 = arith.truncf %0 : vector<8x32xf32> to vector<8x32xbf16>
    %c0_1 = arith.constant 0 : index
    %c0_2 = arith.constant 0 : index
    %2 = vector.load %arg2[%c0_1, %c0_2] : memref<32x32xbf16, #tpu.memory_space<vmem>>, vector<32x32xbf16>
    %cst = arith.constant dense<0.000000e+00> : vector<8x32xf32>
    %3 = tpu.matmul %1, %2, %cst {dimension_numbers = #tpu.dot_dimension_numbers<[1], [0], [0], [1], [0, 0, 1, 1], [], []>} : vector<8x32xbf16>, vector<32x32xbf16>, vector<8x32xf32> -> vector<8x32xf32>
    %c0_3 = arith.constant 0 : index
    %c0_4 = arith.constant 0 : index
    %4 = vector.load %arg3[%c0_3, %c0_4] : memref<1x32xf32, #tpu.memory_space<vmem>>, vector<1x32xf32>
    %5 = vector.broadcast %4 : vector<1x32xf32> to vector<8x32xf32>
    %6 = arith.addf %3, %5 : vector<8x32xf32>
    %7 = arith.addf %6, %0 : vector<8x32xf32>
    %c0_5 = arith.constant 0 : index
    %c0_6 = arith.constant 0 : index
    %8 = vector.load %arg4[%c0_5, %c0_6] : memref<8x32xf32, #tpu.memory_space<vmem>>, vector<8x32xf32>
    tpu.vector_store %arg4[%c0_5, %c0_6], %7 {strides = array<i32>} : memref<8x32xf32, #tpu.memory_space<vmem>>, vector<8x32xf32>,
    return
  }
  func.func @transform_0(%arg0: i32) -> (i32, i32) {
    %c0_i32 = arith.constant 0 : i32
    %c0_i32_0 = arith.constant 0 : i32
    return %arg0, %c0_i32 : i32, i32
  }
  func.func @transform_1(%arg0: i32) -> (i32, i32) {
    %c0_i32 = arith.constant 0 : i32
    %c0_i32_0 = arith.constant 0 : i32
    %c0_i32_1 = arith.constant 0 : i32
    return %c0_i32, %c0_i32_0 : i32, i32
  }
  func.func @transform_2(%arg0: i32) -> (i32, i32) {
    %c0_i32 = arith.constant 0 : i32
    %c0_i32_0 = arith.constant 0 : i32
    %c0_i32_1 = arith.constant 0 : i32
    return %c0_i32, %c0_i32_0 : i32, i32
  }
  func.func @transform_3(%arg0: i32) -> (i32, i32) {
    %c0_i32 = arith.constant 0 : i32
    %c0_i32_0 = arith.constant 0 : i32
    return %arg0, %c0_i32 : i32, i32
  }
}

module attributes {stable_mosaic.version = 11 : i64} {
  func.func @_resident_kernel(%arg0: i32, %arg1: memref<8x32xf32, #tpu.memory_space<vmem>>, %arg2: memref<32x32xbf16, #tpu.memory_space<vmem>>, %arg3: memref<1x32xf32, #tpu.memory_space<vmem>>, %arg4: memref<8x32xf32, #tpu.memory_space<vmem>>) attributes {dimension_semantics = [#tpu.dimension_semantics<parallel>], iteration_bounds = array<i64: 2>, scalar_prefetch = 0 : i64, scratch_operands = 0 : i64, tpu.core_type = #tpu.core_type<tc>, window_params = [{transform_indices = @transform_0, window_bounds = array<i64: 8, 32>}, {pipeline_mode = #tpu.pipeline_mode<synchronous>, transform_indices = @transform_1, window_bounds = array<i64: 32, 32>}, {pipeline_mode = #tpu.pipeline_mode<synchronous>, transform_indices = @transform_2, window_bounds = array<i64: 1, 32>}, {transform_indices = @transform_3, window_bounds = array<i64: 8, 32>}]} {
    %c0 = arith.constant 0 : index
    %c0_0 = arith.constant 0 : index
    %0 = vector.load %arg1[%c0, %c0_0] : memref<8x32xf32, #tpu.memory_space<vmem>>, vector<8x32xf32>
    %1 = arith.truncf %0 : vector<8x32xf32> to vector<8x32xbf16>
    %c0_1 = arith.constant 0 : index
    %c0_2 = arith.constant 0 : index
    %2 = vector.load %arg2[%c0_1, %c0_2] : memref<32x32xbf16, #tpu.memory_space<vmem>>, vector<32x32xbf16>
    %cst = arith.constant dense<0.000000e+00> : vector<8x32xf32>
    %3 = tpu.matmul %1, %2, %cst {dimension_numbers = #tpu.dot_dimension_numbers<[1], [0], [0], [1], [0, 0, 1, 1], [], []>} : vector<8x32xbf16>, vector<32x32xbf16>, vector<8x32xf32> -> vector<8x32xf32>
    %c0_3 = arith.constant 0 : index
    %c0_4 = arith.constant 0 : index
    %4 = vector.load %arg3[%c0_3, %c0_4] : memref<1x32xf32, #tpu.memory_space<vmem>>, vector<1x32xf32>
    %5 = vector.broadcast %4 : vector<1x32xf32> to vector<8x32xf32>
    %6 = arith.addf %3, %5 : vector<8x32xf32>
    %7 = arith.addf %6, %0 : vector<8x32xf32>
    %c0_5 = arith.constant 0 : index
    %c0_6 = arith.constant 0 : index
    %8 = vector.load %arg4[%c0_5, %c0_6] : memref<8x32xf32, #tpu.memory_space<vmem>>, vector<8x32xf32>
    tpu.vector_store %arg4[%c0_5, %c0_6], %7 {strides = array<i32>} : memref<8x32xf32, #tpu.memory_space<vmem>>, vector<8x32xf32>,
    return
  }
  func.func @transform_0(%arg0: i32) -> (i32, i32) {
    %c0_i32 = arith.constant 0 : i32
    %c0_i32_0 = arith.constant 0 : i32
    return %arg0, %c0_i32 : i32, i32
  }
  func.func @transform_1(%arg0: i32) -> (i32, i32) {
    %c0_i32 = arith.constant 0 : i32
    %c0_i32_0 = arith.constant 0 : i32
    %c0_i32_1 = arith.constant 0 : i32
    return %c0_i32, %c0_i32_0 : i32, i32
  }
  func.func @transform_2(%arg0: i32) -> (i32, i32) {
    %c0_i32 = arith.constant 0 : i32
    %c0_i32_0 = arith.constant 0 : i32
    %c0_i32_1 = arith.constant 0 : i32
    return %c0_i32, %c0_i32_0 : i32, i32
  }
  func.func @transform_3(%arg0: i32) -> (i32, i32) {
    %c0_i32 = arith.constant 0 : i32
    %c0_i32_0 = arith.constant 0 : i32
    return %arg0, %c0_i32 : i32, i32
  }
}

</mosaic_0001>

<bundles_post_ra>
// kernel: tpu_custom_call.1
= control target key start
LH: loop header
LB: loop body
LE: loop exit
PB: predicated region body
PF: predicated region fallthrough
CT: control target
= control target key end

     0   :  { %8 = vsyncpa [#allocation3], 0  ;;  %s722_s0 = inlined_call_operand.hbm [shape: f32[16,32], index: 0, kind: input, shape index: {}]   ;;  %s723_s1 = inlined_call_operand.hbm [shape: bf16[32,32], index: 1, kind: input, shape index: {}]   ;;  %s724_s2 = inlined_call_operand.vmem [shape: f32[1,32], index: 2, kind: input, shape index: {}]   ;;  %s725_s3 = inlined_call_operand.hbm [shape: f32[16,32], index: 3, kind: output, shape index: {}]  }
   0x1   :  { %10 = vsyncpa [#allocation3 + $0x1], 0 }
   0x2   :  { %11 = vsyncpa [#allocation6], 0 }
   0x3   :  { %12 = vsyncpa [#allocation4], 0 }
   0x4   :  { %14 = vsyncpa [#allocation4 + $0x1], 0  ;;  %s583_s12 = smov 0   ;;  %s585_s13 = smov 0  }
   0x5   :  { %s587_s14 = smov 0   ;;  %s589_s15 = smov 0  }
   0x6 LB: > { %s130_s18 = sshll.u32 %s723_s1, 4  ;;  %s607_s19 = sadd.s32 4294967295, %s558_s15   ;;  %s558_s15 = sphi %s589_s15, %s735_s15   ;;  %s554_s14 = sphi %s587_s14, %s734_s14   ;;  %s550_s13 = sphi %s585_s13, %s733_s13   ;;  %s546_s12 = sphi %s583_s12, %s732_s12   ;;  %s131_s18 = int_to_ptr.hbm [resolvable:$true] %s130_s18 }
   0x7   : > { %p344_p0 = scmp.ge.s32.totalorder %s558_s15, 1  ;;  %p41_p1 = scmp.eq.s32.totalorder %s607_s19, 0 }
   0x8   : > { %p119_p2 = scmp.lt.s32.totalorder %s558_s15, 3  ;;  %s560_s21 = smov [#allocation5]  }
   0x9   : > { %s132_s22 = sshll.u32 %s560_s21, 4  ;;  %s561_s23 = smov 64   ;;  %s133_s22 = int_to_ptr.vmem [resolvable:$true] %s132_s22 }
   0xa   : > { %p612_p3 = pnand %p344_p0, %p119_p2  ;;  %s562_s24 = smov 4  }
   0xb   : > { %s343_s25 = sadd.s32 4294967294, %s558_s15   ;;  %s623_s26 = sadd.s32 1, %s558_s15  }
   0xc   : > { %p376_p4 = pneg %p612_p3  ;;  %s27_s27 = sadd.s32 1, %s554_s14 }
   0xd   : > { %s24_s28 = ssub.s32 %s558_s15, %s623_s26  ;;  %p34_p7 = scmp.ne.s32.totalorder %s554_s14, %s550_s13 }
   0xe   : > { %p377_p6 = pnand %p376_p4, %p41_p1  ;;  %p25_p8 = scmp.eq.s32.totalorder %s24_s28, 0 }
   0xf   : > { %p35_p9 = scmp.eq.s32.totalorder %s558_s15, 0  ;;  %p40_p10 = scmp.ne.s32.totalorder %s550_s13, %s546_s12 }
  0x10   : > { %379 = dma.hbm_to_vmem [thread:$0]  (!%p377_p6), %s131_s18, 256, %s133_s22, [#allocation6], %s561_s23, %s561_s23, %s562_s24  }
  0x11   : > { %p106_p11 = scmp.eq.s32.totalorder %s607_s19, 1  ;;  %p639_p12 = por %p41_p1, %p40_p10 }
  0x12   : > { %s635_s29 = scalar_select %p25_p8, %s554_s14, %s27_s27  }
  0x13   : > { %p643_p13 = por %p106_p11, %p34_p7  ;;  %p112_p0 = scmp.eq.s32.totalorder %s343_s25, 1 }
  0x14   : > { %p36_p2 = por %p35_p9, %p34_p7  ;;  %s149_s5 = sand.u32 1, %s554_s14  }
  0x15   : > { %p648_p4 = por %p112_p0, %p40_p10  ;;  %p389_p6 = scmp.lt.s32.totalorder %s558_s15, 2 }
  0x16   : > { %s347_s7 = sshll.u32 %s149_s5, 3  ;;  %s348_s8 = sshll.u32 %s558_s15, 3 }
  0x17   : > { %s157_s11 = scalar_lea.hbm %s722_s0, %s348_s8  ;;  %s153_s17 = scalar_lea.vmem [#allocation2], %s347_s7 }
  0x18   : > { %s159_s16 = sshll.u32 %s157_s11, 4  ;;  %s161_s18 = sshll.u32 %s153_s17, 4  ;;  %s160_s16 = int_to_ptr.hbm [resolvable:$true] %s159_s16  ;;  %s162_s18 = int_to_ptr.vmem [resolvable:$true] %s161_s18 }
  0x19   : > { %p657_p8 = pnand %p389_p6, %p36_p2  ;;  %s150_s22 = scalar_lea.sflag [#allocation3], %s149_s5 }
  0x1a   : > { %s458_s23 = sshra.s32 %s160_s16, 4  ;;  %s465_s28 = scalar_lea.hbm %s722_s0, 16  ;;  %s459_s23 = int_to_ptr.hbm [resolvable:$true] %s458_s23 }
  0x1b   : > { %s460_s24 = scalar_lea.hbm %s459_s23, 8  ;;  %p462_p9 = pneg %p657_p8 }
  0x1c   : > { %p461_p7 = scmp.ne.s32.totalorder %s459_s23, %s460_s24  ;;  %p466_p0 = scmp.lt.s32.totalorder %s459_s23, %s722_s0 }
  0x1d   : > { %p467_p2 = scmp.lt.s32.totalorder %s465_s28, %s460_s24 }
  0x1e   : > { %p463_p10 = pnand %p462_p9, %p461_p7 }
  0x1f   : > { %p468_p6 = por %p467_p2, %p466_p0 }
  0x20   : > { %p464_p11 = pneg %p463_p10 }
  0x22   : > { %p469_p5 = pnand %p468_p6, %p464_p11 }
  0x24   : > { %472 = shalt.err (!%p469_p5)
}
  0x25   : > { %383 = dma.hbm_to_vmem [thread:$0]  (!%p657_p8), %s160_s16, 128, %s162_s18, %s150_s22  }
  0x26   : > { %170 = sbr.rel (%p612_p3) target bundleno = 188 (0xbc), region = 32  ;;  %s674_s5 = sand.u32 (!%p612_p3), 1, %s550_s13  }
  0x27   : > { %s350_s9 = sshll.u32 (!%p612_p3), %s674_s5, 3  ;;  %s173_s10 = scalar_lea.sflag (!%p612_p3), [#allocation3], %s674_s5 }
  0x28   : > { %s176_s11 = scalar_lea.vmem (!%p612_p3), [#allocation2], %s350_s9 }
  0x2b   : > { %533 = dma.done.wait (%p639_p12), %s173_s10, 128  }
  0x2c   : > { %535 = vsyncadd (%p639_p12), %s173_s10, 4294967168 }
  0x2d   : > { %537 = dma.done.wait (%p41_p1), [#allocation6], 256  }
  0x2e   : > { %539 = vsyncadd (%p41_p1), [#allocation6], 4294967040  ;;  %v367_v0 = vld [vmem:[#allocation5 + $0x8] sm:$0xff]  ;;  %v366_v1 = vld [vmem:[#allocation5] sm:$0xff]  ;;  %vm228_vm0 = vcmask 261120   ;;  %s363_s20 = sshll.u32 %s607_s19, 3 }
  0x2f   : > { %238 = vmatpush.bf16.msra.mxu0 %v367_v0  ;;  %v206_v2 = vld [vmem:[%s176_s11] sm:$0xff]  ;;  %s258_s21 = scalar_lea.hbm %s725_s3, %s363_s20  ;;  %s204_s22 = scalar_lea.vmem [#allocation7], %s350_s9 }
  0x30   : > { %v207_v3 = vpack.c.bf16 %v206_v2, %v206_v2  ;;  %v427_v4 = vld [vmem:[%s724_s2] ss:$0 sm:$0xff]  ;;  %s260_s23 = sshll.u32 %s204_s22, 4  ;;  %s262_s24 = sshll.u32 %s258_s21, 4  ;;  %s261_s23 = int_to_ptr.vmem [resolvable:$true] %s260_s23  ;;  %s263_s24 = int_to_ptr.hbm [resolvable:$true] %s262_s24 }
  0x31   : > { %s248_s25 = scalar_lea.sflag [#allocation4], %s674_s5  ;;  %s502_s19 = sshra.s32 %s263_s24, 4  ;;  %s503_s19 = int_to_ptr.hbm [resolvable:$true] %s502_s19 }
  0x32   : > { %s504_s27 = scalar_lea.hbm %s503_s19, 8  ;;  %s508_s8 = scalar_lea.hbm %s725_s3, 16 }
  0x33   : > { %239 = vmatpush.bf16.msra.mxu0 %v366_v1  ;;  %p505_p1 = scmp.ne.s32.totalorder %s503_s19, %s504_s27  ;;  %p509_p12 = scmp.lt.s32.totalorder %s503_s19, %s725_s3 }
  0x34   : > { %p510_p8 = scmp.lt.s32.totalorder %s508_s8, %s504_s27 }
  0x35   : > { %p506_p3 = pnand %p505_p1, %p643_p13 }
  0x36   : > { %361 = vmatmul.msk.bf16.vlgmr.msra.gmra.mxu0 %vm228_vm0, %v207_v3  ;;  %p511_p7 = por %p510_p8, %p509_p12 }
  0x37   : > { %p507_p5 = pneg %p506_p3 }
  0x39   : > { %p512_p9 = pnand %p511_p7, %p507_p5 }
  0xb3   : > { %v241_v5 = vpop.f32.mrf.mxu0 }
  0xb4   : > { %v242_v6 = vadd.f32 %v427_v4, %v241_v5 }
  0xb6   : > { %v245_v7 = vadd.f32 %v242_v6, %v206_v2 }
  0xb8   : > { %246 = vst.msk [vmem:[%s204_s22] sm:$0xff] %vm228_vm0, %v245_v7 }
  0xb9   : > { %515 = shalt.err (!%p512_p9)
}
  0xba   : > { %374 = dma.vmem_to_hbm [thread:$0]  (%p643_p13), %s261_s23, 128, %s263_s24, %s248_s25  }
  0xbb   : > { %v243_v8 = vpop.f32.mrf.mxu0 }
  0xbc PF: > { %s274_s5 = sand.u32 1, %s546_s12   ;;  %p731_p10 = scmp.ge.s32.totalorder %s558_s15, 2 }
  0xbd   : > { %s275_s11 = scalar_lea.sflag [#allocation4], %s274_s5 }
  0xbe   : > { %p385_p11 = pnand %p731_p10, %p648_p4 }
  0xc0   : > { %p386_p0 = pneg %p385_p11 }
  0xc2   : > { %541 = dma.done.wait (%p386_p0), %s275_s11, 128  }
  0xc3   : > { %543 = vsyncadd (%p386_p0), %s275_s11, 4294967168  ;;  %p17_p2 = scmp.ge.s32.totalorder %s623_s26, 4   ;;  %s732_s12 = smov %s550_s13 }
  0xc4   : > { %s733_s13 = smov %s554_s14  ;;  %s734_s14 = smov %s635_s29 }
  0xc5   : > { %s735_s15 = smov %s623_s26  ;;  %19 = sbr.rel (!%p17_p2) target bundleno = 6 (0x6), region = 81 }
  0xca   :  { %281 = vsyncpa [#allocation3], 1 }
  0xcb   :  { %283 = vsyncpa [#allocation3 + $0x1], 1 }
  0xcc   :  { %284 = vsyncpa [#allocation6], 1 }
  0xcd   :  { %285 = vsyncpa [#allocation4], 1 }
  0xce   :  { %287 = vsyncpa [#allocation4 + $0x1], 1 }

// kernel: tpu_custom_call.1
= control target key start
LH: loop header
LB: loop body
LE: loop exit
PB: predicated region body
PF: predicated region fallthrough
CT: control target
= control target key end

     0   :  { %8 = vsyncpa [#allocation3], 0  ;;  %s722_s0 = inlined_call_operand.hbm [shape: f32[16,32], index: 0, kind: input, shape index: {}]   ;;  %s723_s1 = inlined_call_operand.hbm [shape: bf16[32,32], index: 1, kind: input, shape index: {}]   ;;  %s724_s2 = inlined_call_operand.vmem [shape: f32[1,32], index: 2, kind: input, shape index: {}]   ;;  %s725_s3 = inlined_call_operand.hbm [shape: f32[16,32], index: 3, kind: output, shape index: {}]  }
   0x1   :  { %10 = vsyncpa [#allocation3 + $0x1], 0 }
   0x2   :  { %11 = vsyncpa [#allocation6], 0 }
   0x3   :  { %12 = vsyncpa [#allocation4], 0 }
   0x4   :  { %14 = vsyncpa [#allocation4 + $0x1], 0  ;;  %s583_s12 = smov 0   ;;  %s585_s13 = smov 0  }
   0x5   :  { %s587_s14 = smov 0   ;;  %s589_s15 = smov 0  }
   0x6 LB: > { %s130_s18 = sshll.u32 %s723_s1, 4  ;;  %s607_s19 = sadd.s32 4294967295, %s558_s15   ;;  %s558_s15 = sphi %s589_s15, %s735_s15   ;;  %s554_s14 = sphi %s587_s14, %s734_s14   ;;  %s550_s13 = sphi %s585_s13, %s733_s13   ;;  %s546_s12 = sphi %s583_s12, %s732_s12   ;;  %s131_s18 = int_to_ptr.hbm [resolvable:$true] %s130_s18 }
   0x7   : > { %p344_p0 = scmp.ge.s32.totalorder %s558_s15, 1  ;;  %p41_p1 = scmp.eq.s32.totalorder %s607_s19, 0 }
   0x8   : > { %p119_p2 = scmp.lt.s32.totalorder %s558_s15, 3  ;;  %s560_s21 = smov [#allocation5]  }
   0x9   : > { %s132_s22 = sshll.u32 %s560_s21, 4  ;;  %s561_s23 = smov 64   ;;  %s133_s22 = int_to_ptr.vmem [resolvable:$true] %s132_s22 }
   0xa   : > { %p612_p3 = pnand %p344_p0, %p119_p2  ;;  %s562_s24 = smov 4  }
   0xb   : > { %s343_s25 = sadd.s32 4294967294, %s558_s15   ;;  %s623_s26 = sadd.s32 1, %s558_s15  }
   0xc   : > { %p376_p4 = pneg %p612_p3  ;;  %s27_s27 = sadd.s32 1, %s554_s14 }
   0xd   : > { %s24_s28 = ssub.s32 %s558_s15, %s623_s26  ;;  %p34_p7 = scmp.ne.s32.totalorder %s554_s14, %s550_s13 }
   0xe   : > { %p377_p6 = pnand %p376_p4, %p41_p1  ;;  %p25_p8 = scmp.eq.s32.totalorder %s24_s28, 0 }
   0xf   : > { %p35_p9 = scmp.eq.s32.totalorder %s558_s15, 0  ;;  %p40_p10 = scmp.ne.s32.totalorder %s550_s13, %s546_s12 }
  0x10   : > { %379 = dma.hbm_to_vmem [thread:$0]  (!%p377_p6), %s131_s18, 256, %s133_s22, [#allocation6], %s561_s23, %s561_s23, %s562_s24  }
  0x11   : > { %p106_p11 = scmp.eq.s32.totalorder %s607_s19, 1  ;;  %p639_p12 = por %p41_p1, %p40_p10 }
  0x12   : > { %s635_s29 = scalar_select %p25_p8, %s554_s14, %s27_s27  }
  0x13   : > { %p643_p13 = por %p106_p11, %p34_p7  ;;  %p112_p0 = scmp.eq.s32.totalorder %s343_s25, 1 }
  0x14   : > { %p36_p2 = por %p35_p9, %p34_p7  ;;  %s149_s5 = sand.u32 1, %s554_s14  }
  0x15   : > { %p648_p4 = por %p112_p0, %p40_p10  ;;  %p389_p6 = scmp.lt.s32.totalorder %s558_s15, 2 }
  0x16   : > { %s347_s7 = sshll.u32 %s149_s5, 3  ;;  %s348_s8 = sshll.u32 %s558_s15, 3 }
  0x17   : > { %s157_s11 = scalar_lea.hbm %s722_s0, %s348_s8  ;;  %s153_s17 = scalar_lea.vmem [#allocation2], %s347_s7 }
  0x18   : > { %s159_s16 = sshll.u32 %s157_s11, 4  ;;  %s161_s18 = sshll.u32 %s153_s17, 4  ;;  %s160_s16 = int_to_ptr.hbm [resolvable:$true] %s159_s16  ;;  %s162_s18 = int_to_ptr.vmem [resolvable:$true] %s161_s18 }
  0x19   : > { %p657_p8 = pnand %p389_p6, %p36_p2  ;;  %s150_s22 = scalar_lea.sflag [#allocation3], %s149_s5 }
  0x1a   : > { %s458_s23 = sshra.s32 %s160_s16, 4  ;;  %s465_s28 = scalar_lea.hbm %s722_s0, 16  ;;  %s459_s23 = int_to_ptr.hbm [resolvable:$true] %s458_s23 }
  0x1b   : > { %s460_s24 = scalar_lea.hbm %s459_s23, 8  ;;  %p462_p9 = pneg %p657_p8 }
  0x1c   : > { %p461_p7 = scmp.ne.s32.totalorder %s459_s23, %s460_s24  ;;  %p466_p0 = scmp.lt.s32.totalorder %s459_s23, %s722_s0 }
  0x1d   : > { %p467_p2 = scmp.lt.s32.totalorder %s465_s28, %s460_s24 }
  0x1e   : > { %p463_p10 = pnand %p462_p9, %p461_p7 }
  0x1f   : > { %p468_p6 = por %p467_p2, %p466_p0 }
  0x20   : > { %p464_p11 = pneg %p463_p10 }
  0x22   : > { %p469_p5 = pnand %p468_p6, %p464_p11 }
  0x24   : > { %472 = shalt.err (!%p469_p5)
}
  0x25   : > { %383 = dma.hbm_to_vmem [thread:$0]  (!%p657_p8), %s160_s16, 128, %s162_s18, %s150_s22  }
  0x26   : > { %170 = sbr.rel (%p612_p3) target bundleno = 188 (0xbc), region = 32  ;;  %s674_s5 = sand.u32 (!%p612_p3), 1, %s550_s13  }
  0x27   : > { %s350_s9 = sshll.u32 (!%p612_p3), %s674_s5, 3  ;;  %s173_s10 = scalar_lea.sflag (!%p612_p3), [#allocation3], %s674_s5 }
  0x28   : > { %s176_s11 = scalar_lea.vmem (!%p612_p3), [#allocation2], %s350_s9 }
  0x2b   : > { %533 = dma.done.wait (%p639_p12), %s173_s10, 128  }
  0x2c   : > { %535 = vsyncadd (%p639_p12), %s173_s10, 4294967168 }
  0x2d   : > { %537 = dma.done.wait (%p41_p1), [#allocation6], 256  }
  0x2e   : > { %539 = vsyncadd (%p41_p1), [#allocation6], 4294967040  ;;  %v367_v0 = vld [vmem:[#allocation5 + $0x8] sm:$0xff]  ;;  %v366_v1 = vld [vmem:[#allocation5] sm:$0xff]  ;;  %vm228_vm0 = vcmask 261120   ;;  %s363_s20 = sshll.u32 %s607_s19, 3 }
  0x2f   : > { %238 = vmatpush.bf16.msra.mxu0 %v367_v0  ;;  %v206_v2 = vld [vmem:[%s176_s11] sm:$0xff]  ;;  %s258_s21 = scalar_lea.hbm %s725_s3, %s363_s20  ;;  %s204_s22 = scalar_lea.vmem [#allocation7], %s350_s9 }
  0x30   : > { %v207_v3 = vpack.c.bf16 %v206_v2, %v206_v2  ;;  %v427_v4 = vld [vmem:[%s724_s2] ss:$0 sm:$0xff]  ;;  %s260_s23 = sshll.u32 %s204_s22, 4  ;;  %s262_s24 = sshll.u32 %s258_s21, 4  ;;  %s261_s23 = int_to_ptr.vmem [resolvable:$true] %s260_s23  ;;  %s263_s24 = int_to_ptr.hbm [resolvable:$true] %s262_s24 }
  0x31   : > { %s248_s25 = scalar_lea.sflag [#allocation4], %s674_s5  ;;  %s502_s19 = sshra.s32 %s263_s24, 4  ;;  %s503_s19 = int_to_ptr.hbm [resolvable:$true] %s502_s19 }
  0x32   : > { %s504_s27 = scalar_lea.hbm %s503_s19, 8  ;;  %s508_s8 = scalar_lea.hbm %s725_s3, 16 }
  0x33   : > { %239 = vmatpush.bf16.msra.mxu0 %v366_v1  ;;  %p505_p1 = scmp.ne.s32.totalorder %s503_s19, %s504_s27  ;;  %p509_p12 = scmp.lt.s32.totalorder %s503_s19, %s725_s3 }
  0x34   : > { %p510_p8 = scmp.lt.s32.totalorder %s508_s8, %s504_s27 }
  0x35   : > { %p506_p3 = pnand %p505_p1, %p643_p13 }
  0x36   : > { %361 = vmatmul.msk.bf16.vlgmr.msra.gmra.mxu0 %vm228_vm0, %v207_v3  ;;  %p511_p7 = por %p510_p8, %p509_p12 }
  0x37   : > { %p507_p5 = pneg %p506_p3 }
  0x39   : > { %p512_p9 = pnand %p511_p7, %p507_p5 }
  0xb3   : > { %v241_v5 = vpop.f32.mrf.mxu0 }
  0xb4   : > { %v242_v6 = vadd.f32 %v427_v4, %v241_v5 }
  0xb6   : > { %v245_v7 = vadd.f32 %v242_v6, %v206_v2 }
  0xb8   : > { %246 = vst.msk [vmem:[%s204_s22] sm:$0xff] %vm228_vm0, %v245_v7 }
  0xb9   : > { %515 = shalt.err (!%p512_p9)
}
  0xba   : > { %374 = dma.vmem_to_hbm [thread:$0]  (%p643_p13), %s261_s23, 128, %s263_s24, %s248_s25  }
  0xbb   : > { %v243_v8 = vpop.f32.mrf.mxu0 }
  0xbc PF: > { %s274_s5 = sand.u32 1, %s546_s12   ;;  %p731_p10 = scmp.ge.s32.totalorder %s558_s15, 2 }
  0xbd   : > { %s275_s11 = scalar_lea.sflag [#allocation4], %s274_s5 }
  0xbe   : > { %p385_p11 = pnand %p731_p10, %p648_p4 }
  0xc0   : > { %p386_p0 = pneg %p385_p11 }
  0xc2   : > { %541 = dma.done.wait (%p386_p0), %s275_s11, 128  }
  0xc3   : > { %543 = vsyncadd (%p386_p0), %s275_s11, 4294967168  ;;  %p17_p2 = scmp.ge.s32.totalorder %s623_s26, 4   ;;  %s732_s12 = smov %s550_s13 }
  0xc4   : > { %s733_s13 = smov %s554_s14  ;;  %s734_s14 = smov %s635_s29 }
  0xc5   : > { %s735_s15 = smov %s623_s26  ;;  %19 = sbr.rel (!%p17_p2) target bundleno = 6 (0x6), region = 81 }
  0xca   :  { %281 = vsyncpa [#allocation3], 1 }
  0xcb   :  { %283 = vsyncpa [#allocation3 + $0x1], 1 }
  0xcc   :  { %284 = vsyncpa [#allocation6], 1 }
  0xcd   :  { %285 = vsyncpa [#allocation4], 1 }
  0xce   :  { %287 = vsyncpa [#allocation4 + $0x1], 1 }

</bundles_post_ra>
